<compile_context>
chip_gen: v6e
topology: v6e:2x2x1
jax: 0.10.0
libtpu: 0.0.40
codegen_flags: <defaults>
</compile_context>

<pallas_src>
import math
import functools

import jax
import jax.numpy as jnp
from jax import lax
from jax.experimental import pallas as pl
from jax.experimental.pallas import tpu as pltpu

BN_EPS = 1e-5  # PyTorch BatchNorm2d default


# --------------------------------------------------------------------------
# Fused Pallas kernel: conv(as matmul) + BN + ReLU + avgpool + 2x(Linear+tanh)
# --------------------------------------------------------------------------
def _scale_ratio_kernel(p_ref, wmat_ref, gamma_ref, beta_ref,
                        ws_ref, bs_ref, wr_ref, br_ref,
                        scale_ref, ratio_ref, *, alpha, bn_eps):
    # p_ref block: (1, 9*Cin, H*W)  -- im2col patches, pixels on the lane axis.
    patches = p_ref[0]                                           # (9*Cin, H*W)
    # 3x3 conv == one MXU matmul against the unfolded weight.
    acc = jnp.dot(wmat_ref[...], patches,
                  preferred_element_type=jnp.float32)            # (Cout, H*W)
    # BatchNorm2d (inference, running_mean=0 / running_var=1) + ReLU, fused.
    inv = 1.0 / math.sqrt(1.0 + bn_eps)
    f = jnp.maximum(acc * (gamma_ref[...] * inv) + beta_ref[...], 0.0)
    # AdaptiveAvgPool2d([1,1]) == mean over the lane (pixel) axis.
    pooled = jnp.mean(f, axis=1, keepdims=True)                  # (Cout, 1)
    # Linear heads (PyTorch layout: W (groups, Cout) @ x), tanh, alpha*x + 1.
    s = jnp.dot(ws_ref[...], pooled, preferred_element_type=jnp.float32) + bs_ref[...]
    r = jnp.dot(wr_ref[...], pooled, preferred_element_type=jnp.float32) + br_ref[...]
    scale_ref[0] = alpha * jnp.tanh(s) + 1.0                     # (groups, 1)
    ratio_ref[0] = alpha * jnp.tanh(r) + 1.0


def _full_spec(shape):
    nd = len(shape)
    return pl.BlockSpec(tuple(shape), lambda i, _nd=nd: (0,) * _nd)


@functools.partial(jax.jit, static_argnames=("alpha",))
def scale_ratio_forward(params, a, b, *, alpha=0.9):
    """ScaleRatio.forward(a, b) -> {'scale': (B, groups), 'ratio': (B, groups)}."""
    x = jnp.concatenate([a, b], axis=1)                          # (B, Cin, H, W)
    B, Cin, H, W = x.shape
    w = params["w1"]                                             # (Cout, Cin, 3, 3)
    Cout = w.shape[0]
    groups = params["ws"].shape[0]

    # --- XLA glue: zero pad + im2col (9 shifted slices), lane-dense layout ---
    xpad = jnp.pad(x, ((0, 0), (0, 0), (1, 1), (1, 1)))          # (B, Cin, H+2, W+2)
    taps = [xpad[:, :, dy:dy + H, dx:dx + W]
            for dy in range(3) for dx in range(3)]               # 9 x (B, Cin, H, W)
    patches = jnp.stack(taps, axis=1).reshape(B, 9 * Cin, H * W)
    # Unfolded conv weight matching the patch row ordering (k*Cin + i).
    wmat = jnp.transpose(w, (0, 2, 3, 1)).reshape(Cout, 9 * Cin)
    gamma = params["g1"].reshape(Cout, 1)
    beta = params["b1"].reshape(Cout, 1)
    ws = params["ws"]                                            # (groups, Cout)
    bs = params["bs"].reshape(groups, 1)
    wr = params["wr"]
    br = params["br"].reshape(groups, 1)

    flops = B * (2 * Cout * 9 * Cin * H * W       # conv matmul
                 + 4 * Cout * H * W               # BN + ReLU + pool
                 + 2 * 2 * groups * Cout)         # two linear heads
    bytes_accessed = 4 * (patches.size + wmat.size + 2 * Cout
                          + 2 * groups * Cout + 2 * groups + 2 * B * groups)
    cost = pl.CostEstimate(flops=int(flops),
                           transcendentals=int(2 * B * groups),
                           bytes_accessed=int(bytes_accessed))

    scale3, ratio3 = pl.pallas_call(
        functools.partial(_scale_ratio_kernel, alpha=alpha, bn_eps=BN_EPS),
        out_shape=(jax.ShapeDtypeStruct((B, groups, 1), jnp.float32),
                   jax.ShapeDtypeStruct((B, groups, 1), jnp.float32)),
        grid=(B,),
        in_specs=[
            pl.BlockSpec((1, 9 * Cin, H * W), lambda i: (i, 0, 0)),
            _full_spec(wmat.shape),
            _full_spec(gamma.shape),
            _full_spec(beta.shape),
            _full_spec(ws.shape),
            _full_spec(bs.shape),
            _full_spec(wr.shape),
            _full_spec(br.shape),
        ],
        out_specs=(pl.BlockSpec((1, groups, 1), lambda i: (i, 0, 0)),
                   pl.BlockSpec((1, groups, 1), lambda i: (i, 0, 0))),
        compiler_params=pltpu.CompilerParams(dimension_semantics=("parallel",)),
        cost_estimate=cost,
    )(patches, wmat, gamma, beta, ws, bs, wr, br)

    return {"scale": scale3[..., 0], "ratio": ratio3[..., 0]}


# --------------------------------------------------------------------------
# Pure-JAX reference (for in-script correctness check)
# --------------------------------------------------------------------------
def scale_ratio_reference(params, a, b, alpha=0.9):
    x = jnp.concatenate([a, b], axis=1)
    f = lax.conv_general_dilated(
        x, params["w1"], window_strides=(1, 1), padding=((1, 1), (1, 1)),
        dimension_numbers=("NCHW", "OIHW", "NCHW"))
    f = (params["g1"].reshape(1, -1, 1, 1) * f / jnp.sqrt(1.0 + BN_EPS)
         + params["b1"].reshape(1, -1, 1, 1))
    f = jax.nn.relu(f)
    pooled = jnp.mean(f, axis=(2, 3))
    scale = alpha * jnp.tanh(pooled @ params["ws"].T + params["bs"]) + 1.0
    ratio = alpha * jnp.tanh(pooled @ params["wr"].T + params["br"]) + 1.0
    return {"scale": scale, "ratio": ratio}


# --------------------------------------------------------------------------
# Deterministic parameter init (shapes follow the nn.Module __init__)
# --------------------------------------------------------------------------
def _linear_init(key, din, dout):
    kw, kb = jax.random.split(key)
    bound = 1.0 / math.sqrt(din)
    w = jax.random.uniform(kw, (dout, din), jnp.float32, -bound, bound)  # torch layout
    b = jax.random.uniform(kb, (dout,), jnp.float32, -bound, bound)
    return w, b


def init_scale_ratio(key, a_ch, b_ch, groups=4, inner_multi=4):
    ks = jax.random.split(key, 3)
    cin = a_ch + b_ch
    gi = groups * inner_multi
    bound = 1.0 / math.sqrt(cin * 9)
    p = {}
    p["w1"] = jax.random.uniform(ks[0], (gi, cin, 3, 3), jnp.float32, -bound, bound)
    p["g1"], p["b1"] = jnp.ones(gi, jnp.float32), jnp.zeros(gi, jnp.float32)
    p["ws"], p["bs"] = _linear_init(ks[1], gi, groups)
    p["wr"], p["br"] = _linear_init(ks[2], gi, groups)
    return p


# --------------------------------------------------------------------------
if __name__ == "__main__":
    key = jax.random.PRNGKey(0)
    B, a_ch, b_ch, H, W = 2, 8, 8, 16, 16
    groups, inner_multi, alpha = 4, 4, 0.9

    kp, ka, kb = jax.random.split(key, 3)
    params = init_scale_ratio(kp, a_ch, b_ch, groups=groups, inner_multi=inner_multi)
    a = jax.random.normal(ka, (B, a_ch, H, W), jnp.float32)
    b = jax.random.normal(kb, (B, b_ch, H, W), jnp.float32)

    out = scale_ratio_forward(params, a, b, alpha=alpha)
    out = jax.block_until_ready(out)

    assert out["scale"].shape == (B, groups), out["scale"].shape
    assert out["ratio"].shape == (B, groups), out["ratio"].shape
    assert bool(jnp.all(jnp.isfinite(out["scale"])))
    assert bool(jnp.all(jnp.isfinite(out["ratio"])))

    ref = scale_ratio_reference(params, a, b, alpha=alpha)
    assert bool(jnp.allclose(out["scale"], ref["scale"], atol=1e-3, rtol=1e-3))
    assert bool(jnp.allclose(out["ratio"], ref["ratio"], atol=1e-3, rtol=1e-3))

    print("KERNEL_OK")
</pallas_src>

<mosaic_0001>
module attributes {stable_mosaic.version = 11 : i64} {
  func.func @_scale_ratio_kernel(%arg0: i32, %arg1: memref<1x144x256xf32, #tpu.memory_space<vmem>>, %arg2: memref<16x144xf32, #tpu.memory_space<vmem>>, %arg3: memref<16x1xf32, #tpu.memory_space<vmem>>, %arg4: memref<16x1xf32, #tpu.memory_space<vmem>>, %arg5: memref<4x16xf32, #tpu.memory_space<vmem>>, %arg6: memref<4x1xf32, #tpu.memory_space<vmem>>, %arg7: memref<4x16xf32, #tpu.memory_space<vmem>>, %arg8: memref<4x1xf32, #tpu.memory_space<vmem>>, %arg9: memref<1x4x1xf32, #tpu.memory_space<vmem>>, %arg10: memref<1x4x1xf32, #tpu.memory_space<vmem>>) attributes {dimension_semantics = [#tpu.dimension_semantics<parallel>], iteration_bounds = array<i64: 2>, scalar_prefetch = 0 : i64, scratch_operands = 0 : i64, tpu.core_type = #tpu.core_type<tc>, window_params = [{transform_indices = @transform_0, window_bounds = array<i64: 1, 144, 256>}, {pipeline_mode = #tpu.pipeline_mode<synchronous>, transform_indices = @transform_1, window_bounds = array<i64: 16, 144>}, {pipeline_mode = #tpu.pipeline_mode<synchronous>, transform_indices = @transform_2, window_bounds = array<i64: 16, 1>}, {pipeline_mode = #tpu.pipeline_mode<synchronous>, transform_indices = @transform_3, window_bounds = array<i64: 16, 1>}, {pipeline_mode = #tpu.pipeline_mode<synchronous>, transform_indices = @transform_4, window_bounds = array<i64: 4, 16>}, {pipeline_mode = #tpu.pipeline_mode<synchronous>, transform_indices = @transform_5, window_bounds = array<i64: 4, 1>}, {pipeline_mode = #tpu.pipeline_mode<synchronous>, transform_indices = @transform_6, window_bounds = array<i64: 4, 16>}, {pipeline_mode = #tpu.pipeline_mode<synchronous>, transform_indices = @transform_7, window_bounds = array<i64: 4, 1>}, {transform_indices = @transform_8, window_bounds = array<i64: 1, 4, 1>}, {transform_indices = @transform_9, window_bounds = array<i64: 1, 4, 1>}]} {
    %c0 = arith.constant 0 : index
    %c0_0 = arith.constant 0 : index
    %c0_1 = arith.constant 0 : index
    %0 = vector.load %arg1[%c0, %c0_0, %c0_1] : memref<1x144x256xf32, #tpu.memory_space<vmem>>, vector<1x144x256xf32>
    %1 = vector.shape_cast %0 : vector<1x144x256xf32> to vector<144x256xf32>
    %c0_2 = arith.constant 0 : index
    %c0_3 = arith.constant 0 : index
    %2 = vector.load %arg2[%c0_2, %c0_3] : memref<16x144xf32, #tpu.memory_space<vmem>>, vector<16x144xf32>
    %cst = arith.constant dense<0.000000e+00> : vector<16x256xf32>
    %3 = tpu.matmul %2, %1, %cst {dimension_numbers = #tpu.dot_dimension_numbers<[1], [0], [0], [1], [0, 0, 1, 1], [], []>} : vector<16x144xf32>, vector<144x256xf32>, vector<16x256xf32> -> vector<16x256xf32>
    %c0_4 = arith.constant 0 : index
    %c0_5 = arith.constant 0 : index
    %4 = vector.load %arg3[%c0_4, %c0_5] : memref<16x1xf32, #tpu.memory_space<vmem>>, vector<16x1xf32>
    %cst_6 = arith.constant 0.999994993 : f32
    %5 = vector.broadcast %cst_6 : f32 to vector<16x1xf32>
    %6 = arith.mulf %4, %5 : vector<16x1xf32>
    %7 = vector.broadcast %6 : vector<16x1xf32> to vector<16x256xf32>
    %8 = arith.mulf %3, %7 : vector<16x256xf32>
    %c0_7 = arith.constant 0 : index
    %c0_8 = arith.constant 0 : index
    %9 = vector.load %arg4[%c0_7, %c0_8] : memref<16x1xf32, #tpu.memory_space<vmem>>, vector<16x1xf32>
    %10 = vector.broadcast %9 : vector<16x1xf32> to vector<16x256xf32>
    %11 = arith.addf %8, %10 : vector<16x256xf32>
    %cst_9 = arith.constant 0.000000e+00 : f32
    %12 = vector.broadcast %cst_9 : f32 to vector<16x256xf32>
    %13 = arith.maximumf %11, %12 : vector<16x256xf32>
    %cst_10 = arith.constant dense<0.000000e+00> : vector<16xf32>
    %14 = vector.multi_reduction <add>, %13, %cst_10 [1] : vector<16x256xf32> to vector<16xf32>
    %15 = vector.shape_cast %14 : vector<16xf32> to vector<16x1xf32>
    %cst_11 = arith.constant 2.560000e+02 : f32
    %16 = vector.broadcast %cst_11 : f32 to vector<16x1xf32>
    %17 = arith.divf %15, %16 : vector<16x1xf32>
    %c0_12 = arith.constant 0 : index
    %c0_13 = arith.constant 0 : index
    %18 = vector.load %arg5[%c0_12, %c0_13] : memref<4x16xf32, #tpu.memory_space<vmem>>, vector<4x16xf32>
    %cst_14 = arith.constant dense<0.000000e+00> : vector<4x1xf32>
    %19 = tpu.matmul %18, %17, %cst_14 {dimension_numbers = #tpu.dot_dimension_numbers<[1], [0], [0], [1], [0, 0, 1, 1], [], []>} : vector<4x16xf32>, vector<16x1xf32>, vector<4x1xf32> -> vector<4x1xf32>
    %c0_15 = arith.constant 0 : index
    %c0_16 = arith.constant 0 : index
    %20 = vector.load %arg6[%c0_15, %c0_16] : memref<4x1xf32, #tpu.memory_space<vmem>>, vector<4x1xf32>
    %21 = arith.addf %19, %20 : vector<4x1xf32>
    %c0_17 = arith.constant 0 : index
    %c0_18 = arith.constant 0 : index
    %22 = vector.load %arg7[%c0_17, %c0_18] : memref<4x16xf32, #tpu.memory_space<vmem>>, vector<4x16xf32>
    %cst_19 = arith.constant dense<0.000000e+00> : vector<4x1xf32>
    %23 = tpu.matmul %22, %17, %cst_19 {dimension_numbers = #tpu.dot_dimension_numbers<[1], [0], [0], [1], [0, 0, 1, 1], [], []>} : vector<4x16xf32>, vector<16x1xf32>, vector<4x1xf32> -> vector<4x1xf32>
    %c0_20 = arith.constant 0 : index
    %c0_21 = arith.constant 0 : index
    %24 = vector.load %arg8[%c0_20, %c0_21] : memref<4x1xf32, #tpu.memory_space<vmem>>, vector<4x1xf32>
    %25 = arith.addf %23, %24 : vector<4x1xf32>
    %26 = math.tanh %21 : vector<4x1xf32>
    %cst_22 = arith.constant 0.899999976 : f32
    %27 = vector.broadcast %cst_22 : f32 to vector<4x1xf32>
    %28 = arith.mulf %27, %26 : vector<4x1xf32>
    %cst_23 = arith.constant 1.000000e+00 : f32
    %29 = vector.broadcast %cst_23 : f32 to vector<4x1xf32>
    %30 = arith.addf %28, %29 : vector<4x1xf32>
    %c0_24 = arith.constant 0 : index
    %c0_25 = arith.constant 0 : index
    %c0_26 = arith.constant 0 : index
    %31 = vector.load %arg9[%c0_24, %c0_25, %c0_26] : memref<1x4x1xf32, #tpu.memory_space<vmem>>, vector<1x4x1xf32>
    %32 = vector.shape_cast %31 : vector<1x4x1xf32> to vector<4x1xf32>
    %33 = vector.shape_cast %30 : vector<4x1xf32> to vector<1x4x1xf32>
    tpu.vector_store %arg9[%c0_24, %c0_25, %c0_26], %33 {strides = array<i32>} : memref<1x4x1xf32, #tpu.memory_space<vmem>>, vector<1x4x1xf32>,
    %34 = math.tanh %25 : vector<4x1xf32>
    %cst_27 = arith.constant 0.899999976 : f32
    %35 = vector.broadcast %cst_27 : f32 to vector<4x1xf32>
    %36 = arith.mulf %35, %34 : vector<4x1xf32>
    %cst_28 = arith.constant 1.000000e+00 : f32
    %37 = vector.broadcast %cst_28 : f32 to vector<4x1xf32>
    %38 = arith.addf %36, %37 : vector<4x1xf32>
    %c0_29 = arith.constant 0 : index
    %c0_30 = arith.constant 0 : index
    %c0_31 = arith.constant 0 : index
    %39 = vector.load %arg10[%c0_29, %c0_30, %c0_31] : memref<1x4x1xf32, #tpu.memory_space<vmem>>, vector<1x4x1xf32>
    %40 = vector.shape_cast %39 : vector<1x4x1xf32> to vector<4x1xf32>
    %41 = vector.shape_cast %38 : vector<4x1xf32> to vector<1x4x1xf32>
    tpu.vector_store %arg10[%c0_29, %c0_30, %c0_31], %41 {strides = array<i32>} : memref<1x4x1xf32, #tpu.memory_space<vmem>>, vector<1x4x1xf32>,
    return
  }
  func.func @transform_0(%arg0: i32) -> (i32, i32, i32) {
    %c0_i32 = arith.constant 0 : i32
    %c0_i32_0 = arith.constant 0 : i32
    %c0_i32_1 = arith.constant 0 : i32
    return %arg0, %c0_i32, %c0_i32_0 : i32, i32, i32
  }
  func.func @transform_1(%arg0: i32) -> (i32, i32) {
    %c0_i32 = arith.constant 0 : i32
    %c0_i32_0 = arith.constant 0 : i32
    %c0_i32_1 = arith.constant 0 : i32
    return %c0_i32, %c0_i32_0 : i32, i32
  }
  func.func @transform_2(%arg0: i32) -> (i32, i32) {
    %c0_i32 = arith.constant 0 : i32
    %c0_i32_0 = arith.constant 0 : i32
    %c0_i32_1 = arith.constant 0 : i32
    return %c0_i32, %c0_i32_0 : i32, i32
  }
  func.func @transform_3(%arg0: i32) -> (i32, i32) {
    %c0_i32 = arith.constant 0 : i32
    %c0_i32_0 = arith.constant 0 : i32
    %c0_i32_1 = arith.constant 0 : i32
    return %c0_i32, %c0_i32_0 : i32, i32
  }
  func.func @transform_4(%arg0: i32) -> (i32, i32) {
    %c0_i32 = arith.constant 0 : i32
    %c0_i32_0 = arith.constant 0 : i32
    %c0_i32_1 = arith.constant 0 : i32
    return %c0_i32, %c0_i32_0 : i32, i32
  }
  func.func @transform_5(%arg0: i32) -> (i32, i32) {
    %c0_i32 = arith.constant 0 : i32
    %c0_i32_0 = arith.constant 0 : i32
    %c0_i32_1 = arith.constant 0 : i32
    return %c0_i32, %c0_i32_0 : i32, i32
  }
  func.func @transform_6(%arg0: i32) -> (i32, i32) {
    %c0_i32 = arith.constant 0 : i32
    %c0_i32_0 = arith.constant 0 : i32
    %c0_i32_1 = arith.constant 0 : i32
    return %c0_i32, %c0_i32_0 : i32, i32
  }
  func.func @transform_7(%arg0: i32) -> (i32, i32) {
    %c0_i32 = arith.constant 0 : i32
    %c0_i32_0 = arith.constant 0 : i32
    %c0_i32_1 = arith.constant 0 : i32
    return %c0_i32, %c0_i32_0 : i32, i32
  }
  func.func @transform_8(%arg0: i32) -> (i32, i32, i32) {
    %c0_i32 = arith.constant 0 : i32
    %c0_i32_0 = arith.constant 0 : i32
    %c0_i32_1 = arith.constant 0 : i32
    return %arg0, %c0_i32, %c0_i32_0 : i32, i32, i32
  }
  func.func @transform_9(%arg0: i32) -> (i32, i32, i32) {
    %c0_i32 = arith.constant 0 : i32
    %c0_i32_0 = arith.constant 0 : i32
    %c0_i32_1 = arith.constant 0 : i32
    return %arg0, %c0_i32, %c0_i32_0 : i32, i32, i32
  }
}

</mosaic_0001>

<bundles_post_ra>
// kernel: scale_ratio_forward.1
= control target key start
LH: loop header
LB: loop body
LE: loop exit
PB: predicated region body
PF: predicated region fallthrough
CT: control target
= control target key end

     0   :  { %s869_s30 = smov 0   ;;  %s971_s0 = inlined_call_operand.vmem [shape: f32[2,144,256], index: 0, kind: input, shape index: {}]   ;;  %s972_s1 = inlined_call_operand.vmem [shape: f32[16,144], index: 1, kind: input, shape index: {}]   ;;  %s973_s2 = inlined_call_operand.vmem [shape: f32[16,1], index: 2, kind: input, shape index: {}]   ;;  %s974_s3 = inlined_call_operand.vmem [shape: f32[16,1], index: 3, kind: input, shape index: {}]   ;;  %s975_s4 = inlined_call_operand.vmem [shape: f32[4,16], index: 4, kind: input, shape index: {}]   ;;  %s976_s5 = inlined_call_operand.vmem [shape: f32[4,1], index: 5, kind: input, shape index: {}]   ;;  %s977_s6 = inlined_call_operand.vmem [shape: f32[4,16], index: 6, kind: input, shape index: {}]   ;;  %s978_s7 = inlined_call_operand.vmem [shape: f32[4,1], index: 7, kind: input, shape index: {}]   ;;  %s979_s8 = inlined_call_operand.vmem [shape: f32[2,4,1], index: 8, kind: output, shape index: {0}]   ;;  %s980_s9 = inlined_call_operand.vmem [shape: f32[2,4,1], index: 9, kind: output, shape index: {1}]  }
   0x1 LB: > { %s756_s10 = sadd.s32 4294967295, %s814_s30   ;;  %p760_p0 = scmp.ge.s32.totalorder %s814_s30, 1  ;;  %s814_s30 = sphi %s869_s30, %s20_s30  }
   0x2   : > { %p290_p1 = scmp.lt.s32.totalorder %s814_s30, 3 }
   0x4   : > { %p291_p2 = pnand %p760_p0, %p290_p1 }
   0x5   : > { %p329_p3 = scmp.lt.s32.totalorder (!%p291_p2), %s756_s10, 1 }
   0x6   : > { %294 = sbr.rel (%p291_p2) target bundleno = 620 (0x26c), region = 52 }
   0xb   : > { %v379_v0 = vld [vmem:[%s972_s1 + $0x8] sm:$0xff]  ;;  %vm382_vm0 = vcmask 130048   ;;  %v816_v1 = vmov 0   ;;  %s982_s10 = smov (!%p329_p3, %s756_s10), 1  ;;  %v466_v5 = vld [vmem:[%s973_s2] sm:$0xff]  ;;  %v381_v45 = vld [vmem:[%s972_s1 + $0x18] sm:$0xff] }
   0xc   : > { %764 = vmatprep.mubr.msk.f32.mxu0 %vm382_vm0, %v379_v0  ;;  %802 = vset.pattern.permute.xlu0 %v816_v1  ;;  %v467_v2 = vld [vmem:[%s973_s2 + $0x8] sm:$0xff]  ;;  %s790_s19 = smul.u32 288, %s982_s10  ;;  %v468_v6 = vmul.f32 0.999995, %v466_v5  ;;  %v484_v7 = vld [vmem:[%s974_s3] sm:$0xff]  ;;  %v380_v46 = vld [vmem:[%s972_s1 + $0x10] sm:$0xff] }
   0xd   : > { %v485_v3 = vld [vmem:[%s974_s3 + $0x8] sm:$0xff]  ;;  %v469_v4 = vmul.f32 0.999995, %v467_v2  ;;  %803 = vset.pattern.permute.xlu1 %v816_v1  ;;  %v378_v44 = vld [vmem:[%s972_s1] sm:$0xff]  ;;  %v817_v5 = vmov 0.0   ;;  %vm818_vm1 = vmmov 0  }
   0xe   : > { %493 = vperm.xlu1 %803, %v485_v3   ;;  %s899_s24 = scalar_lea.vmem %s971_s0, %s790_s19  ;;  %776 = vmatprep.subr.mxu1 %v817_v5  ;;  %s762_s20 = sshll.u32 %s982_s10, 2  ;;  %vm666_vm2 = vcmask 3072  }
   0xf   : > { %477 = vperm.xlu0 %802, %v469_v4   ;;  %v373_v8 = vld [vmem:[%s899_s24 + $0xf8] sm:$0xff]  ;;  %v372_v9 = vld [vmem:[%s899_s24 + $0xf0] sm:$0xff]  ;;  %v371_v10 = vld [vmem:[%s899_s24 + $0xe8] sm:$0xff]  ;;  %780 = vmatprep.mubr.msk.f32.mxu1 %vm818_vm1, %v817_v5  ;;  %s337_s23 = scalar_lea.vmem %s979_s8, %s762_s20  ;;  %s341_s26 = scalar_lea.vmem %s980_s9, %s762_s20 }
  0x10   : > { %389 = vmatprep.subr.mxu0 %v373_v8  ;;  %v370_v11 = vld [vmem:[%s899_s24 + $0xe0] sm:$0xff]  ;;  %v369_v12 = vld [vmem:[%s899_s24 + $0xd8] sm:$0xff]  ;;  %v368_v13 = vld [vmem:[%s899_s24 + $0xd0] sm:$0xff] }
  0x11   : > { %390 = vmatpush1.msra.mxu0 %v372_v9  ;;  %v367_v14 = vld [vmem:[%s899_s24 + $0xc8] sm:$0xff]  ;;  %v366_v15 = vld [vmem:[%s899_s24 + $0xc0] sm:$0xff]  ;;  %v365_v16 = vld [vmem:[%s899_s24 + $0xb8] sm:$0xff] }
  0x12   : > { %488 = vperm.xlu1 %803, %v484_v7   ;;  %391 = vmatprep.subr.mxu0 %v371_v10  ;;  %v364_v17 = vld [vmem:[%s899_s24 + $0xb0] sm:$0xff]  ;;  %v363_v18 = vld [vmem:[%s899_s24 + $0xa8] sm:$0xff]  ;;  %v362_v19 = vld [vmem:[%s899_s24 + $0xa0] sm:$0xff] }
  0x13   : > { %472 = vperm.xlu0 %802, %v468_v6   ;;  %392 = vmatpush1.msra.mxu0 %v370_v11  ;;  %v361_v20 = vld [vmem:[%s899_s24 + $0x98] sm:$0xff]  ;;  %v360_v21 = vld [vmem:[%s899_s24 + $0x90] sm:$0xff]  ;;  %v359_v22 = vld [vmem:[%s899_s24 + $0x88] sm:$0xff] }
  0x14   : > { %393 = vmatprep.subr.mxu0 %v369_v12  ;;  %v358_v23 = vld [vmem:[%s899_s24 + $0x80] sm:$0xff]  ;;  %v357_v24 = vld [vmem:[%s899_s24 + $0x78] sm:$0xff]  ;;  %v356_v25 = vld [vmem:[%s899_s24 + $0x70] sm:$0xff] }
  0x15   : > { %394 = vmatpush1.msra.mxu0 %v368_v13  ;;  %v355_v26 = vld [vmem:[%s899_s24 + $0x68] sm:$0xff]  ;;  %v354_v27 = vld [vmem:[%s899_s24 + $0x60] sm:$0xff]  ;;  %v353_v28 = vld [vmem:[%s899_s24 + $0x58] sm:$0xff] }
  0x16   : > { %395 = vmatprep.subr.mxu0 %v367_v14  ;;  %v352_v29 = vld [vmem:[%s899_s24 + $0x50] sm:$0xff]  ;;  %v351_v30 = vld [vmem:[%s899_s24 + $0x48] sm:$0xff]  ;;  %v350_v31 = vld [vmem:[%s899_s24 + $0x40] sm:$0xff] }
  0x17   : > { %396 = vmatpush1.msra.mxu0 %v366_v15  ;;  %v349_v32 = vld [vmem:[%s899_s24 + $0x38] sm:$0xff]  ;;  %v348_v33 = vld [vmem:[%s899_s24 + $0x30] sm:$0xff]  ;;  %v347_v34 = vld [vmem:[%s899_s24 + $0x28] sm:$0xff] }
  0x18   : > { %397 = vmatprep.subr.mxu0 %v365_v16  ;;  %v346_v35 = vld [vmem:[%s899_s24 + $0x20] sm:$0xff]  ;;  %v345_v36 = vld [vmem:[%s899_s24 + $0x18] sm:$0xff]  ;;  %v344_v37 = vld [vmem:[%s899_s24 + $0x10] sm:$0xff] }
  0x19   : > { %398 = vmatpush1.msra.mxu0 %v364_v17  ;;  %v343_v38 = vld [vmem:[%s899_s24 + $0x8] sm:$0xff]  ;;  %v342_v39 = vld [vmem:[%s899_s24] sm:$0xff]  ;;  %v377_v40 = vld [vmem:[%s899_s24 + $0x118] sm:$0xff] }
  0x1a   : > { %399 = vmatprep.subr.mxu0 %v363_v18  ;;  %v376_v41 = vld [vmem:[%s899_s24 + $0x110] sm:$0xff]  ;;  %v375_v42 = vld [vmem:[%s899_s24 + $0x108] sm:$0xff]  ;;  %v374_v43 = vld [vmem:[%s899_s24 + $0x100] sm:$0xff] }
  0x1b   : > { %400 = vmatpush1.msra.mxu0 %v362_v19  ;;  %v513_v10 = vld [vmem:[%s975_s4] sm:$0xf] }
  0x1c   : > { %401 = vmatprep.subr.mxu0 %v361_v20  ;;  %v588_v11 = vld [vmem:[%s977_s6] sm:$0xf] }
  0x1d   : > { %402 = vmatpush1.msra.mxu0 %v360_v21  ;;  %v514_v12 = vld [vmem:[%s976_s5] sm:$0xf] }
  0x1e   : > { %403 = vmatprep.subr.mxu0 %v359_v22  ;;  %v589_v16 = vld [vmem:[%s978_s7] sm:$0xf] }
  0x1f   : > { %404 = vmatpush1.msra.mxu0 %v358_v23 }
  0x20   : > { %405 = vmatprep.subr.mxu0 %v357_v24 }
  0x21   : > { %406 = vmatpush1.msra.mxu0 %v356_v25 }
  0x22   : > { %407 = vmatprep.subr.mxu0 %v355_v26 }
  0x23   : > { %408 = vmatpush1.msra.mxu0 %v354_v27 }
  0x24   : > { %409 = vmatprep.subr.mxu0 %v353_v28 }
  0x25   : > { %410 = vmatpush1.msra.mxu0 %v352_v29 }
  0x26   : > { %411 = vmatprep.subr.mxu0 %v351_v30 }
  0x27   : > { %412 = vmatpush1.msra.mxu0 %v350_v31 }
  0x28   : > { %413 = vmatprep.subr.mxu0 %v349_v32 }
  0x29   : > { %414 = vmatpush1.msra.mxu0 %v348_v33 }
  0x2a   : > { %415 = vmatprep.subr.mxu0 %v347_v34 }
  0x2b   : > { %416 = vmatpush1.msra.mxu0 %v346_v35 }
  0x2c   : > { %417 = vmatprep.subr.mxu0 %v345_v36 }
  0x2d   : > { %418 = vmatpush1.msra.mxu0 %v344_v37 }
  0x2e   : > { %419 = vmatprep.subr.mxu0 %v343_v38 }
  0x2f   : > { %420 = vmatpush1.msra.mxu0 %v342_v39 }
  0x30   : > { %449 = vmatprep.subr.mxu0 %v377_v40 }
  0x31   : > { %450 = vmatpush2.msra.mxu0 %v376_v41 }
  0x32   : > { %451 = vmatprep.subr.mxu0 %v375_v42 }
  0x33   : > { %452 = vmatpush2.msra.mxu0 %v374_v43 }
  0x34   : > { %454 = vmatmul.mubr.f32.vlgmr.msra.gmra.mxu0 %v378_v44 }
  0x35   : > { %765 = vmatprep.mubr.msk.f32.mxu0 %vm382_vm0, %v381_v45 }
  0x38   : > { %460 = vmatmul.mubr.f32.gmra.mxu0 %v380_v46 }
  0x89   : > { %v494_v48 = vpop.permute.xlu1 %493 }
  0x8a   : > { %v478_v47 = vpop.permute.xlu0 %477 }
  0x8d   : > { %v489_v51 = vpop.permute.xlu1 %488 }
  0x8e   : > { %v473_v49 = vpop.permute.xlu0 %472 }
  0xf4   : > { %v455_v50 = vpop.f32.mrf.mxu0 }
  0xf5   : > { %v480_v52 = vmul.f32 %v473_v49, %v455_v50 }
  0xf6   : > { %v457_v53 = vpop.f32.mrf.mxu0 }
  0xf7   : > { %v496_v54 = vadd.f32 %v489_v51, %v480_v52  ;;  %v481_v55 = vmul.f32 %v473_v49, %v457_v53 }
  0xf8   : > { %v461_v56 = vpop.f32.mrf.mxu0 }
  0xf9   : > { %v497_v57 = vadd.f32 %v489_v51, %v481_v55  ;;  %v482_v58 = vmul.f32 %v478_v47, %v461_v56  ;;  %v500_v60 = vmax.f32 %v496_v54, 0.0 }
  0xfa   : > { %v463_v59 = vpop.f32.mrf.mxu0 }
  0xfb   : > { %v501_v61 = vmax.f32 %v497_v57, 0.0  ;;  %v498_v62 = vadd.f32 %v494_v48, %v482_v58  ;;  %v483_v63 = vmul.f32 %v478_v47, %v463_v59 }
  0xfd   : > { %v499_v0 = vadd.f32 %v494_v48, %v483_v63  ;;  %v504_v1 = vadd.f32 %v501_v61, %v500_v60  ;;  %v502_v2 = vmax.f32 %v498_v62, 0.0 }
  0xff   : > { %v503_v3 = vmax.f32 %v499_v0, 0.0  ;;  %505 = vadd.xlane.f32.xlu1 %v504_v1 }
 0x101   : > { %v507_v4 = vadd.f32 %v503_v3, %v502_v2 }
 0x103   : > { %508 = vadd.xlane.f32.xlu0 %v507_v4 }
 0x188   : > { %v506_v6 = vpop.xlane.xlu1 %505 }
 0x189   : > { %v511_v9 = vmul.f32 0.00390625, %v506_v6 }
 0x18c   : > { %v509_v7 = vpop.xlane.xlu0 %508 }
 0x18d   : > { %v512_v8 = vmul.f32 0.00390625, %v509_v7 }
 0x18f   : > { %777 = vmatpush3.msra.mxu1 %v512_v8 }
 0x190   : > { %778 = vmatprep.subr.mxu1 %v817_v5 }
 0x191   : > { %779 = vmatpush3.msra.mxu1 %v511_v9 }
 0x192   : > { %781 = vmatmul.mubr.msk.f32.vlgmr.msra.gmra.mxu1 %vm382_vm0, %v513_v10  ;;  %783 = vmatprep.subr.mxu1 %v817_v5 }
 0x193   : > { %784 = vmatpush3.msra.mxu1 %v512_v8  ;;  %787 = vmatprep.mubr.msk.f32.mxu1 %vm818_vm1, %v817_v5 }
 0x194   : > { %785 = vmatprep.subr.mxu1 %v817_v5 }
 0x195   : > { %786 = vmatpush3.msra.mxu1 %v511_v9 }
 0x196   : > { %788 = vmatmul.mubr.msk.f32.vlgmr.msra.gmra.mxu1 %vm382_vm0, %v588_v11 }
 0x252   : > { %v584_v13 = vpop.f32.mrf.mxu1 }
 0x253   : > { %v585_v14 = vadd.f32 %v584_v13, %v514_v12 }
 0x254   : > { %v782_v15 = vpop.f32.mrf.mxu1 }
 0x255   : > { %804 = vtanh.f32 %v585_v14 }
 0x256   : > { %v659_v17 = vpop.f32.mrf.mxu1 }
 0x257   : > { %v660_v18 = vadd.f32 %v659_v17, %v589_v16 }
 0x258   : > { %v789_v19 = vpop.f32.mrf.mxu1 }
 0x259   : > { %806 = vtanh.f32 %v660_v18 }
 0x262   : > { %v805_v20 = vpop.eup %804 }
 0x263   : > { %v664_v21 = vmul.f32 0.9, %v805_v20 }
 0x265   : > { %v665_v22 = vadd.f32 1.0, %v664_v21 }
 0x266   : > { %v807_v23 = vpop.eup %806 }
 0x267   : > { %667 = vst.msk [vmem:[%s337_s23] sm:$0xf] %vm666_vm2, %v665_v22  ;;  %v669_v24 = vmul.f32 0.9, %v807_v23 }
 0x269   : > { %v670_v25 = vadd.f32 1.0, %v669_v24 }
 0x26b   : > { %671 = vst.msk [vmem:[%s341_s26] sm:$0xf] %vm666_vm2, %v670_v25 }
 0x26c PF: > { %s20_s30 = sadd.s32 1, %s814_s30  }
 0x26d   : > { %p17_p4 = scmp.ge.s32.totalorder %s20_s30, 4  }
 0x26f   :  { %19 = sbr.rel (!%p17_p4) target bundleno = 1 (0x1), region = 94 }

</bundles_post_ra>
